<compile_context>
chip_gen: v6e
topology: v6e:2x2x1
jax: 0.10.0
libtpu: 0.0.40
codegen_flags: <defaults>
</compile_context>

<pallas_src>
import numpy as np
import jax
import jax.numpy as jnp
from jax.experimental import pallas as pl
from jax.experimental.pallas import tpu as pltpu


def _vmem_capacity_bytes():
    """Physical VMEM per core; falls back to 128 MiB if the query fails."""
    try:
        info = pltpu.get_tpu_info()
        cap = getattr(info, "vmem_capacity_bytes", None)
        if cap:
            return int(cap)
    except Exception:
        pass
    return 128 * 1024 * 1024


def _pick_row_tile(C, H, TW, itemsize, budget_bytes):
    """Largest H-tile TH (multiple of the packed sublane count, dividing H,
    or H itself) whose (C, TH, TW) tile fits the budget."""
    sub = 8 * max(4 // itemsize, 1)          # f32: 8, bf16: 16, int8/fp8: 32
    if C * H * TW * itemsize <= budget_bytes:
        return H
    max_th = max(budget_bytes // (C * TW * itemsize), sub)
    th = (max_th // sub) * sub
    while th >= sub:
        if H % th == 0:
            return th
        th -= sub
    # TODO(synk): irregular H with a huge C*TW row; falls back to whole-H
    # blocks (may exceed the VMEM budget for pathological shapes).
    return H


def _make_hflip_kernel(n_c, fuse_channels, compute_dtype, precision):
    """Kernel factory.  One grid step = one (C, TH, TW) tile of one image.

    flip_ref : SMEM int32 (B,)    scalar-prefetched flip decisions
    img_ref  : VMEM (C, TH, TW)   input tile; the index_map already selected
                                  the mirrored W-block when flipping
    out_ref  : VMEM (C, TH, TW)   output tile
    """
    def kernel(flip_ref, img_ref, out_ref):
        b = pl.program_id(0)
        do_flip = flip_ref[b] != 0

        @pl.when(do_flip)
        def _():
            c, th, tw = img_ref.shape
            # Constant 0/1 lane-reversal permutation, built only on flipped
            # tiles (16K VPU ops — negligible, no HBM fetch, no VMEM buffer).
            row = jax.lax.broadcasted_iota(jnp.int32, (tw, tw), 0)
            col = jax.lax.broadcasted_iota(jnp.int32, (tw, tw), 1)
            perm = (row == (tw - 1 - col)).astype(compute_dtype)
            if fuse_channels:
                # One matmul + one whole-tile, lane-dense store for all C.
                x = img_ref[...].astype(compute_dtype).reshape(c * th, tw)
                rev = jnp.dot(x, perm, precision=precision,
                              preferred_element_type=jnp.float32)
                out_ref[...] = rev.reshape(c, th, tw).astype(out_ref.dtype)
            else:
                for ci in range(n_c):        # rare fallback (TH not packed)
                    x = img_ref[ci].astype(compute_dtype)
                    rev = jnp.dot(x, perm, precision=precision,
                                  preferred_element_type=jnp.float32)
                    out_ref[ci, :, :] = rev.astype(out_ref.dtype)

        @pl.when(jnp.logical_not(do_flip))
        def _():
            out_ref[...] = img_ref[...]      # straight lane-dense copy

    return kernel


def random_horizontal_flip(img, boxes, key, *, image_width, p=0.5):
    """img: (B, C, H, W); boxes: (B, N, 4) as [x1, y1, x2, y2].

    Returns (flip_mask int32 (B,), img_out, boxes_out).
    # TODO(synk): the PyTorch module returns a dynamic-length Python list of
    # flipped indices; a static-shape int32 mask is returned instead.
    """
    B, C, H, W = img.shape
    itemsize = img.dtype.itemsize

    coins = jax.random.uniform(key, (B,), dtype=jnp.float32)
    flip = (coins > p).astype(jnp.int32)            # analog of `indexes`

    # ---- boxes: trivial elementwise transform, done in the wrapper --------
    Wf = jnp.asarray(image_width, dtype=boxes.dtype)
    flipped_boxes = jnp.stack(
        [Wf - boxes[..., 2], boxes[..., 1], Wf - boxes[..., 0], boxes[..., 3]],
        axis=-1)
    boxes_out = jnp.where((flip > 0)[:, None, None], flipped_boxes, boxes)

    # ---- image: Pallas kernel ----------------------------------------------
    TW = 128 if W % 128 == 0 else W                  # lane-block size
    n_w = W // TW

    capacity = _vmem_capacity_bytes()
    budget = max(capacity // 16, 4 << 20)            # ~8 MiB on 128-MiB chips, 4 MiB on v7x
    TH = _pick_row_tile(C, H, TW, itemsize, budget)
    n_h = H // TH

    sub = 8 * max(4 // itemsize, 1)
    fuse_channels = (TH % sub == 0)                  # reshape (C,TH)->(C*TH) is layout-free

    if jnp.issubdtype(img.dtype, jnp.floating):
        compute_dtype = img.dtype
        precision = (jax.lax.Precision.HIGHEST if img.dtype == jnp.float32
                     else jax.lax.Precision.DEFAULT)  # bf16 0/1 perm is exact in 1 pass
    else:
        compute_dtype = jnp.float32                   # exact for |x| < 2^24 (e.g. uint8)
        precision = jax.lax.Precision.HIGHEST

    kernel = _make_hflip_kernel(C, fuse_channels, compute_dtype, precision)

    # When flipping, read W-blocks in mirrored order; lane reversal within the
    # 128-lane block happens in-kernel.  Output blocks are always in order.
    def in_map(b, h, w, flips):
        w_in = jnp.where(flips[b] != 0, n_w - 1 - w, w)
        return (b, 0, h, w_in)

    def out_map(b, h, w, flips):
        return (b, 0, h, w)

    tile_bytes = C * TH * TW * itemsize
    vmem_limit = int(min(max(4 * tile_bytes + (4 << 20), 32 << 20),
                         capacity - (16 << 20)))

    grid_spec = pltpu.PrefetchScalarGridSpec(
        num_scalar_prefetch=1,
        grid=(B, n_h, n_w),
        in_specs=[pl.BlockSpec((None, C, TH, TW), in_map)],
        out_specs=pl.BlockSpec((None, C, TH, TW), out_map),
    )

    img_out = pl.pallas_call(
        kernel,
        out_shape=jax.ShapeDtypeStruct((B, C, H, W), img.dtype),
        grid_spec=grid_spec,
        compiler_params=pltpu.CompilerParams(
            dimension_semantics=("parallel", "parallel", "arbitrary"),
            vmem_limit_bytes=vmem_limit,
        ),
    )(flip, img)

    return flip, img_out, boxes_out


if __name__ == "__main__":
    def _run_and_check(B, C, H, W, N, seed):
        key = jax.random.PRNGKey(seed)
        k_img, k_box, k_coin = jax.random.split(key, 3)

        img = jax.random.normal(k_img, (B, C, H, W), dtype=jnp.float32)
        boxes = jax.random.uniform(k_box, (B, N, 4), dtype=jnp.float32)
        boxes = boxes * jnp.asarray([W, H, W, H], dtype=jnp.float32)

        flip, img_out, boxes_out = random_horizontal_flip(
            img, boxes, k_coin, image_width=W, p=0.5)
        jax.block_until_ready((flip, img_out, boxes_out))

        # --- reference check (pure numpy) -----------------------------------
        fm = np.asarray(flip).astype(bool)
        img_np = np.asarray(img)
        boxes_np = np.asarray(boxes)
        img_expect = np.where(fm[:, None, None, None],
                              img_np[:, :, :, ::-1], img_np)
        boxes_flipped = np.stack(
            [W - boxes_np[..., 2], boxes_np[..., 1],
             W - boxes_np[..., 0], boxes_np[..., 3]], axis=-1)
        boxes_expect = np.where(fm[:, None, None], boxes_flipped, boxes_np)
        np.testing.assert_allclose(np.asarray(img_out), img_expect,
                                   rtol=1e-6, atol=1e-6)
        np.testing.assert_allclose(np.asarray(boxes_out), boxes_expect,
                                   rtol=1e-6, atol=1e-6)
        return fm

    fm = _run_and_check(2, 4, 16, 128, 8, seed=0)   # n_w = 1 path
    _run_and_check(2, 3, 16, 256, 8, seed=1)        # n_w = 2: block-reversed index_map

    indexes = np.nonzero(fm)[0].tolist()  # parity with the PyTorch return value
    print("KERNEL_OK")
</pallas_src>

<mosaic_0001>
module attributes {stable_mosaic.version = 11 : i64} {
  func.func @kernel(%arg0: i32, %arg1: i32, %arg2: i32, %arg3: memref<2xi32, #tpu.memory_space<smem>>, %arg4: memref<1x4x16x128xf32, #tpu.memory_space<vmem>>, %arg5: memref<1x4x16x128xf32, #tpu.memory_space<vmem>>) attributes {dimension_semantics = [#tpu.dimension_semantics<parallel>, #tpu.dimension_semantics<parallel>, #tpu.dimension_semantics<arbitrary>], iteration_bounds = array<i64: 2, 1, 1>, scalar_prefetch = 1 : i64, scratch_operands = 0 : i64, tpu.core_type = #tpu.core_type<tc>, window_params = [{transform_indices = @transform_0, window_bounds = array<i64: 1, 4, 16, 128>}, {transform_indices = @transform_1, window_bounds = array<i64: 1, 4, 16, 128>}]} {
    %0 = arith.index_cast %arg0 : i32 to index
    %1 = memref.load %arg3[%0] : memref<2xi32, #tpu.memory_space<smem>>
    %c0_i32 = arith.constant 0 : i32
    %2 = arith.cmpi ne, %1, %c0_i32 : i32
    %3 = arith.extui %2 : i1 to i32
    %c0_i32_0 = arith.constant 0 : i32
    %4 = arith.cmpi ne, %3, %c0_i32_0 : i32
    scf.if %4 {
      %8 = tpu.iota {dimensions = array<i32: 0>} : vector<128x128xi32>
      %9 = tpu.iota {dimensions = array<i32: 1>} : vector<128x128xi32>
      %c127_i32 = arith.constant 127 : i32
      %10 = vector.broadcast %c127_i32 : i32 to vector<128x128xi32>
      %11 = arith.subi %10, %9 : vector<128x128xi32>
      %12 = arith.cmpi eq, %8, %11 : vector<128x128xi32>
      %13 = arith.extui %12 : vector<128x128xi1> to vector<128x128xi32>
      %14 = arith.sitofp %13 : vector<128x128xi32> to vector<128x128xf32>
      %c0 = arith.constant 0 : index
      %c0_2 = arith.constant 0 : index
      %c0_3 = arith.constant 0 : index
      %c0_4 = arith.constant 0 : index
      %15 = vector.load %arg4[%c0, %c0_2, %c0_3, %c0_4] : memref<1x4x16x128xf32, #tpu.memory_space<vmem>>, vector<1x4x16x128xf32>
      %16 = vector.shape_cast %15 : vector<1x4x16x128xf32> to vector<4x16x128xf32>
      %17 = vector.shape_cast %16 : vector<4x16x128xf32> to vector<64x128xf32>
      %cst = arith.constant dense<0.000000e+00> : vector<64x128xf32>
      %18 = tpu.matmul %17, %14, %cst {dimension_numbers = #tpu.dot_dimension_numbers<[1], [0], [0], [1], [0, 0, 1, 1], [], []>, precision = #tpu.contract_precision<fp32>} : vector<64x128xf32>, vector<128x128xf32>, vector<64x128xf32> -> vector<64x128xf32>
      %19 = vector.shape_cast %18 : vector<64x128xf32> to vector<4x16x128xf32>
      %c0_5 = arith.constant 0 : index
      %c0_6 = arith.constant 0 : index
      %c0_7 = arith.constant 0 : index
      %c0_8 = arith.constant 0 : index
      %20 = vector.load %arg5[%c0_5, %c0_6, %c0_7, %c0_8] : memref<1x4x16x128xf32, #tpu.memory_space<vmem>>, vector<1x4x16x128xf32>
      %21 = vector.shape_cast %20 : vector<1x4x16x128xf32> to vector<4x16x128xf32>
      %22 = vector.shape_cast %19 : vector<4x16x128xf32> to vector<1x4x16x128xf32>
      tpu.vector_store %arg5[%c0_5, %c0_6, %c0_7, %c0_8], %22 {strides = array<i32>} : memref<1x4x16x128xf32, #tpu.memory_space<vmem>>, vector<1x4x16x128xf32>,
    } else {
    }
    %true = arith.constant true
    %5 = arith.xori %2, %true : i1
    %6 = arith.extui %5 : i1 to i32
    %c0_i32_1 = arith.constant 0 : i32
    %7 = arith.cmpi ne, %6, %c0_i32_1 : i32
    scf.if %7 {
      %c0 = arith.constant 0 : index
      %c0_2 = arith.constant 0 : index
      %c0_3 = arith.constant 0 : index
      %c0_4 = arith.constant 0 : index
      %8 = vector.load %arg4[%c0, %c0_2, %c0_3, %c0_4] : memref<1x4x16x128xf32, #tpu.memory_space<vmem>>, vector<1x4x16x128xf32>
      %9 = vector.shape_cast %8 : vector<1x4x16x128xf32> to vector<4x16x128xf32>
      %c0_5 = arith.constant 0 : index
      %c0_6 = arith.constant 0 : index
      %c0_7 = arith.constant 0 : index
      %c0_8 = arith.constant 0 : index
      %10 = vector.load %arg5[%c0_5, %c0_6, %c0_7, %c0_8] : memref<1x4x16x128xf32, #tpu.memory_space<vmem>>, vector<1x4x16x128xf32>
      %11 = vector.shape_cast %10 : vector<1x4x16x128xf32> to vector<4x16x128xf32>
      %12 = vector.shape_cast %9 : vector<4x16x128xf32> to vector<1x4x16x128xf32>
      tpu.vector_store %arg5[%c0_5, %c0_6, %c0_7, %c0_8], %12 {strides = array<i32>} : memref<1x4x16x128xf32, #tpu.memory_space<vmem>>, vector<1x4x16x128xf32>,
    } else {
    }
    return
  }
  func.func @transform_0(%arg0: i32, %arg1: i32, %arg2: i32, %arg3: memref<2xi32, #tpu.memory_space<smem>>) -> (i32, i32, i32, i32) {
    %0 = arith.index_cast %arg0 : i32 to index
    %1 = memref.load %arg3[%0] : memref<2xi32, #tpu.memory_space<smem>>
    %c0_i32 = arith.constant 0 : i32
    %2 = arith.cmpi ne, %1, %c0_i32 : i32
    %c0_i32_0 = arith.constant 0 : i32
    %3 = arith.subi %c0_i32_0, %arg2 : i32
    %4 = arith.select %2, %3, %arg2 : i32
    %c0_i32_1 = arith.constant 0 : i32
    %c0_i32_2 = arith.constant 0 : i32
    return %arg0, %c0_i32_1, %arg1, %4 : i32, i32, i32, i32
  }
  func.func @transform_1(%arg0: i32, %arg1: i32, %arg2: i32, %arg3: memref<2xi32, #tpu.memory_space<smem>>) -> (i32, i32, i32, i32) {
    %c0_i32 = arith.constant 0 : i32
    %c0_i32_0 = arith.constant 0 : i32
    return %arg0, %c0_i32, %arg1, %arg2 : i32, i32, i32, i32
  }
}

</mosaic_0001>

<bundles_post_ra>
// kernel: tpu_custom_call.1
= control target key start
LH: loop header
LB: loop body
LE: loop exit
PB: predicated region body
PF: predicated region fallthrough
CT: control target
= control target key end

     0   :  { %s2028_s9 = smov [#allocation3]   ;;  %s2979_s0 = inlined_call_operand.hbm [shape: s32[2], index: 0, kind: input, shape index: {}]   ;;  %s2980_s1 = inlined_call_operand.hbm [shape: f32[2,4,16,128], index: 1, kind: input, shape index: {}]   ;;  %s2981_s2 = inlined_call_operand.hbm [shape: f32[2,4,16,128], index: 2, kind: output, shape index: {}]  }
   0x1   :  { %8 = dma.hbm_to_smem %s2979_s0, 16, %s2028_s9, [#allocation2] }
   0x2   :  { %1994 = dma.done.wait [#allocation2], 16 }
   0x3   :  { %1995 = vsyncadd [#allocation2], 4294967280 }
   0x4   :  { %10 = sfence }
   0x5   :  { %11 = vsyncpa [#allocation5], 0 }
   0x6   :  { %13 = vsyncpa [#allocation5 + $0x1], 0 }
   0x7   :  { %14 = vsyncpa [#allocation6], 0 }
   0x8   :  { %16 = vsyncpa [#allocation6 + $0x1], 0  ;;  %s2055_s12 = smov 0   ;;  %s2057_s13 = smov 0  }
   0x9   :  { %s2059_s14 = smov 0   ;;  %s2061_s15 = smov 0  }
   0xa   :  { %s2063_s16 = smov 0   ;;  %s2065_s17 = smov 0  }
   0xb LB: > { %s1348_s0 = sadd.s32 4294967295, %s2026_s17   ;;  %s1349_s18 = sadd.s32 4294967294, %s2026_s17   ;;  %s2026_s17 = sphi %s2065_s17, %s22_s17   ;;  %s2022_s16 = sphi %s2063_s16, %s3043_s16   ;;  %s2018_s15 = sphi %s2061_s15, %s3042_s15   ;;  %s2014_s14 = sphi %s2059_s14, %s3041_s14   ;;  %s2010_s13 = sphi %s2057_s13, %s3040_s13   ;;  %s2006_s12 = sphi %s2055_s12, %s3039_s12  }
   0xc   : > { %s41_s19 = sadd.s32 1, %s2022_s16  ;;  %s60_s20 = sadd.s32 1, %s2014_s14 }
   0xd   : > { %p43_p0 = scmp.ge.s32.totalorder %s41_s19, 2  ;;  %p67_p1 = scmp.ne.s32.totalorder %s2014_s14, %s2010_s13 }
   0xe   : > { %p68_p2 = scmp.eq.s32.totalorder %s2026_s17, 0  ;;  %p73_p3 = scmp.ne.s32.totalorder %s2010_s13, %s2006_s12 }
   0xf   : > { %s3045_s19 = smov (%p43_p0, %s41_s19), 0  ;;  %p74_p5 = scmp.eq.s32.totalorder %s1348_s0, 0 }
  0x10   : > { %p2096_p4 = por %p68_p2, %p67_p1  ;;  %s53_s22 = ssub.s32 %s2022_s16, %s3045_s19 }
  0x11   : > { %p101_p6 = scmp.eq.s32.totalorder %s1348_s0, 1  ;;  %p58_p7 = scmp.eq.s32.totalorder %s53_s22, 0 }
  0x12   : > { %p2102_p8 = por %p74_p5, %p73_p3  ;;  %p107_p10 = scmp.eq.s32.totalorder %s1349_s18, 1 }
  0x13   : > { %p2106_p9 = por %p101_p6, %p67_p1  ;;  %p1851_p13 = scmp.lt.s32.totalorder %s2026_s17, 2 }
  0x14   : > { %s2111_s25 = scalar_select %p58_p7, %s2014_s14, %s60_s20  }
  0x15   : > { %p2113_p11 = por %p107_p10, %p73_p3  ;;  %s127_s27 = sand.u32 1, %s2014_s14  }
  0x16   : > { %s1352_s28 = sshll.u32 %s127_s27, 6  ;;  %s1429_s29 = sshll.u32 %s2022_s16, 10 }
  0x17   : > { %s144_s4 = scalar_lea.hbm %s2980_s1, %s1429_s29  ;;  %s131_s5 = scalar_lea.vmem [#allocation4], %s1352_s28 }
  0x18   : > { %s145_s6 = sshll.u32 %s131_s5, 4  ;;  %p2126_p0 = pnand %p1851_p13, %p2096_p4  ;;  %s146_s6 = int_to_ptr.vmem [resolvable:$true] %s145_s6 }
  0x19   : > { %p1355_p1 = scmp.ge.s32.totalorder %s2026_s17, 1  ;;  %s128_s8 = scalar_lea.sflag [#allocation5], %s127_s27 }
  0x1a   : > { %p1918_p2 = pneg %p2126_p0  ;;  %s1929_s9 = scalar_lea.vmem %s146_s6, 1024 }
  0x1b   : > { %p1930_p3 = scmp.ne.s32.totalorder %s146_s6, %s1929_s9  ;;  %s2029_s10 = smov [#allocation4]  }
  0x1c   : > { %s1934_s11 = sshll.u32 %s2029_s10, 4  ;;  %s1935_s11 = int_to_ptr.vmem [resolvable:$false] %s1934_s11 }
  0x1d   : > { %p1932_p5 = pnand %p1930_p3, %p1918_p2  ;;  %s1936_s0 = scalar_lea.vmem %s1935_s11, 2048 }
  0x1e   : > { %p1937_p7 = scmp.lt.s32.totalorder %s146_s6, %s1935_s11  ;;  %p1938_p10 = scmp.lt.s32.totalorder %s1936_s0, %s1929_s9 }
  0x1f   : > { %p1933_p6 = pneg %p1932_p5 }
  0x20   : > { %p1939_p12 = por %p1938_p10, %p1937_p7 }
  0x22   : > { %p1940_p4 = pnand %p1939_p12, %p1933_p6 }
  0x24   : > { %1943 = shalt.err (!%p1940_p4)
}
  0x25   : > { %s2030_s18 = smov 128   ;;  %s2031_s20 = smov 8  }
  0x26   : > { %1846 = dma.hbm_to_vmem [thread:$0]  (!%p2126_p0), %s144_s4, 1024, %s146_s6, %s128_s8, %s2030_s18, %s2030_s18, %s2031_s20  }
  0x27   : > { %p153_p13 = scmp.lt.s32.totalorder %s2026_s17, 3 }
  0x29   : > { %p154_p2 = pnand %p1355_p1, %p153_p13 }
  0x2a   : > { %s2139_s21 = sand.u32 (!%p154_p2), 1, %s2010_s13  }
  0x2b   : > { %157 = sbr.rel (%p154_p2) target bundleno = 436 (0x1b4), region = 24  ;;  %s1356_s22 = sshll.u32 (!%p154_p2), %s2139_s21, 6 }
  0x2c   : > { %s160_s27 = scalar_lea.sflag (!%p154_p2), [#allocation5], %s2139_s21  ;;  %s2143_s28 = scalar_lea.vmem (!%p154_p2), [#allocation4], %s1356_s22 }
  0x30   : > { %1997 = dma.done.wait (%p2102_p8), %s160_s27, 1024  }
  0x31   : > { %1999 = vsyncadd (%p2102_p8), %s160_s27, 4294966272  ;;  %s2150_s29 = sld [smem:[#allocation3 + %s2018_s15]]  ;;  %s2152_s30 = scalar_lea.vmem [#allocation7], %s1356_s22 }
  0x37   : > { %p1358_p12 = scmp.eq.s32.totalorder %s2150_s29, 0 }
  0x39   : > { %192 = sbr.rel (%p1358_p12) target bundleno = 400 (0x190), region = 32 }
  0x3e   : > { %v193_v0 = vlaneseq  ;;  %v261_v1 = vld [vmem:[%s2143_s28] sm:$0xff]  ;;  %v2161_v5 = vld [vmem:[%s2143_s28 + $0x8] sm:$0xff]  ;;  %v2988_v17 = vmov 1.0   ;;  %v2033_v20 = vmov 0.0  }
  0x3f   : > { %v2156_v2 = vand.u32 4294901760, %v261_v1  ;;  %v2188_v16 = vand.u32 4294901760, %v2161_v5 }
  0x40   : > { %v2158_v3 = vshrl.u32 %v193_v0, 7  ;;  %v211_v4 = vand.u32 127, %v193_v0 }
  0x41   : > { %2997 = vst [vmem:[#allocation11_spill] sm:$0xff] %v2156_v2  ;;  %1651 = vmatprep.mubr.f32.mxu1 %v2156_v2  ;;  %v2207_v22 = vsub.f32 %v261_v1, %v2156_v2 }
  0x42   : > { %v209_v6 = vadd.s32 120, %v2158_v3  ;;  %v2165_v7 = vsub.s32 127, %v211_v4  ;;  %v208_v8 = vadd.s32 112, %v2158_v3  ;;  %v207_v9 = vadd.s32 104, %v2158_v3 }
  0x43   : > { %v206_v10 = vadd.s32 96, %v2158_v3  ;;  %v205_v11 = vadd.s32 88, %v2158_v3  ;;  %v204_v12 = vadd.s32 80, %v2158_v3  ;;  %v203_v25 = vadd.s32 72, %v2158_v3 }
  0x44   : > { %vm2173_vm0 = vcmp.eq.s32.totalorder %v209_v6, %v2165_v7  ;;  %vm2178_vm1 = vcmp.eq.s32.totalorder %v208_v8, %v2165_v7  ;;  %vm2183_vm2 = vcmp.eq.s32.totalorder %v207_v9, %v2165_v7  ;;  %v202_v32 = vadd.s32 64, %v2158_v3 }
  0x45   : > { %1575 = vmatprep.subr.msk.mxu0 %vm2173_vm0, %v2988_v17  ;;  %vm2194_vm3 = vcmp.eq.s32.totalorder %v206_v10, %v2165_v7  ;;  %vm2199_vm4 = vcmp.eq.s32.totalorder %v205_v11, %v2165_v7  ;;  %v1374_v21 = vsel %vm2173_vm0, 1.0, %v2033_v20  ;;  %v1373_v24 = vsel %vm2178_vm1, 1.0, %v2033_v20 }
  0x46   : > { %1576 = vmatpush3.msk.msra.mxu0 %vm2173_vm0, %v2988_v17  ;;  %v2212_v23 = vsub.f32 %v1374_v21, %v1374_v21  ;;  %v1372_v26 = vsel %vm2183_vm2, 1.0, %v2033_v20  ;;  %vm2225_vm5 = vcmp.eq.s32.totalorder %v204_v12, %v2165_v7  ;;  %v2229_v28 = vsub.f32 %v1373_v24, %v1373_v24 }
  0x47   : > { %1577 = vmatprep.subr.msk.mxu0 %vm2178_vm1, %v2988_v17  ;;  %v2231_v29 = vsub.f32 %v1372_v26, %v1372_v26  ;;  %v1371_v30 = vsel %vm2194_vm3, 1.0, %v2033_v20  ;;  %v1370_v34 = vsel %vm2199_vm4, 1.0, %v2033_v20  ;;  %v201_v37 = vadd.s32 56, %v2158_v3 }
  0x48   : > { %1578 = vmatpush3.msk.msra.mxu0 %vm2178_vm1, %v2988_v17  ;;  %v2240_v31 = vand.u32 4294901760, %v2212_v23  ;;  %v2243_v33 = vsub.f32 %v1371_v30, %v1371_v30  ;;  %v2252_v35 = vand.u32 4294901760, %v2229_v28  ;;  %v2258_v38 = vsub.f32 %v1370_v34, %v1370_v34  ;;  %v3037_v18 = vld [vmem:[#allocation11_spill] sm:$0xff] }
  0x49   : > { %1579 = vmatprep.subr.msk.mxu0 %vm2183_vm2, %v2988_v17  ;;  %v2255_v36 = vand.u32 4294901760, %v2231_v29  ;;  %vm2266_vm6 = vcmp.eq.s32.totalorder %v203_v25, %v2165_v7  ;;  %v1369_v42 = vsel %vm2225_vm5, 1.0, %v2033_v20  ;;  %v200_v46 = vadd.s32 48, %v2158_v3 }
  0x4a   : > { %1580 = vmatpush3.msk.msra.mxu0 %vm2183_vm2, %v2988_v17  ;;  %v434_v39 = vsub.f32 %v2212_v23, %v2240_v31  ;;  %v2271_v41 = vand.u32 4294901760, %v2243_v33  ;;  %v441_v43 = vsub.f32 %v2229_v28, %v2252_v35  ;;  %v2284_v45 = vand.u32 4294901760, %v2258_v38 }
  0x4b   : > { %1581 = vmatprep.subr.msk.mxu0 %vm2194_vm3, %v2988_v17  ;;  %v448_v44 = vsub.f32 %v2231_v29, %v2255_v36  ;;  %vm2291_vm7 = vcmp.eq.s32.totalorder %v202_v32, %v2165_v7  ;;  %v2297_v50 = vsub.f32 %v1369_v42, %v1369_v42  ;;  %vm2303_vm8 = vcmp.eq.s32.totalorder %v201_v37, %v2165_v7 }
  0x4c   : > { %1582 = vmatpush3.msk.msra.mxu0 %vm2194_vm3, %v2988_v17  ;;  %v435_v47 = vand.u32 4294901760, %v434_v39  ;;  %v455_v49 = vsub.f32 %v2243_v33, %v2271_v41  ;;  %v442_v51 = vand.u32 4294901760, %v441_v43  ;;  %v199_v53 = vadd.s32 40, %v2158_v3 }
  0x4d   : > { %1583 = vmatprep.subr.msk.mxu0 %vm2199_vm4, %v2988_v17  ;;  %v1368_v54 = vsel %vm2266_vm6, 1.0, %v2033_v20  ;;  %v449_v55 = vand.u32 4294901760, %v448_v44  ;;  %v462_v56 = vsub.f32 %v2258_v38, %v2284_v45  ;;  %v2317_v57 = vand.u32 4294901760, %v2297_v50 }
  0x4e   : > { %1584 = vmatpush3.msk.msra.mxu0 %vm2199_vm4, %v2988_v17  ;;  %1619 = vmatprep.subr.mxu1 %v435_v47  ;;  %v2319_v58 = vsub.f32 %v1368_v54, %v1368_v54  ;;  %v456_v59 = vand.u32 4294901760, %v455_v49  ;;  %vm2325_vm9 = vcmp.eq.s32.totalorder %v200_v46, %v2165_v7  ;;  %v198_v61 = vadd.s32 32, %v2158_v3 }
  0x4f   : > { %1585 = vmatprep.subr.msk.mxu0 %vm2225_vm5, %v2988_v17  ;;  %1620 = vmatpush3.msra.mxu1 %v435_v47  ;;  %v1367_v62 = vsel %vm2291_vm7, 1.0, %v2033_v20  ;;  %v469_v63 = vsub.f32 %v2297_v50, %v2317_v57  ;;  %v1366_v4 = vsel %vm2303_vm8, 1.0, %v2033_v20  ;;  %vm2350_vm10 = vcmp.eq.s32.totalorder %v199_v53, %v2165_v7 }
  0x50   : > { %1586 = vmatpush3.msk.msra.mxu0 %vm2225_vm5, %v2988_v17  ;;  %1621 = vmatprep.subr.mxu1 %v442_v51  ;;  %v2339_v0 = vand.u32 4294901760, %v2319_v58  ;;  %v2341_v1 = vsub.f32 %v1367_v62, %v1367_v62  ;;  %v197_v8 = vadd.s32 24, %v2158_v3  ;;  %v2355_v9 = vsub.f32 %v1366_v4, %v1366_v4 }
  0x51   : > { %1587 = vmatprep.subr.msk.mxu0 %vm2266_vm6, %v2988_v17  ;;  %1622 = vmatpush3.msra.mxu1 %v442_v51  ;;  %v196_v10 = vadd.s32 16, %v2158_v3  ;;  %v463_v11 = vand.u32 4294901760, %v462_v56  ;;  %v1365_v24 = vsel %vm2325_vm9, 1.0, %v2033_v20  ;;  %vm2373_vm11 = vcmp.eq.s32.totalorder %v198_v61, %v2165_v7 }
  0x52   : > { %1588 = vmatpush3.msk.msra.mxu0 %vm2266_vm6, %v2988_v17  ;;  %1623 = vmatprep.subr.mxu1 %v449_v55  ;;  %v476_v12 = vsub.f32 %v2319_v58, %v2339_v0  ;;  %v2364_v21 = vand.u32 4294901760, %v2341_v1  ;;  %v2378_v26 = vand.u32 4294901760, %v2355_v9  ;;  %v2380_v30 = vsub.f32 %v1365_v24, %v1365_v24 }
  0x53   : > { %1589 = vmatprep.subr.msk.mxu0 %vm2291_vm7, %v2988_v17  ;;  %1624 = vmatpush3.msra.mxu1 %v449_v55  ;;  %v195_v32 = vadd.s32 8, %v2158_v3  ;;  %v470_v34 = vand.u32 4294901760, %v469_v63  ;;  %v1364_v39 = vsel %vm2350_vm10, 1.0, %v2033_v20  ;;  %v2393_v42 = vsub.f32 %v2161_v5, %v2188_v16 }
  0x54   : > { %1590 = vmatpush3.msk.msra.mxu0 %vm2291_vm7, %v2988_v17  ;;  %1625 = vmatprep.subr.mxu1 %v456_v59  ;;  %v483_v37 = vsub.f32 %v2341_v1, %v2364_v21  ;;  %vm2399_vm12 = vcmp.eq.s32.totalorder %v197_v8, %v2165_v7  ;;  %vm2404_vm13 = vcmp.eq.s32.totalorder %v196_v10, %v2165_v7  ;;  %v2409_v46 = vand.u32 4294901760, %v2380_v30 }
  0x55   : > { %1591 = vmatprep.subr.msk.mxu0 %vm2303_vm8, %v2988_v17  ;;  %1626 = vmatpush3.msra.mxu1 %v456_v59  ;;  %v2411_v5 = vsub.f32 %v1364_v39, %v1364_v39  ;;  %v477_v47 = vand.u32 4294901760, %v476_v12  ;;  %v490_v49 = vsub.f32 %v2355_v9, %v2378_v26  ;;  %v1363_v51 = vsel %vm2373_vm11, 1.0, %v2033_v20 }
  0x56   : > { %1592 = vmatpush3.msk.msra.mxu0 %vm2303_vm8, %v2988_v17  ;;  %1627 = vmatprep.subr.mxu1 %v463_v11  ;;  %vm2425_vm14 = vcmp.eq.s32.totalorder %v195_v32, %v2165_v7  ;;  %vm2434_vm15 = vcmp.eq.s32.totalorder %v2158_v3, %v2165_v7  ;;  %v2438_v56 = vsub.f32 %v1363_v51, %v1363_v51  ;;  %v484_v59 = vand.u32 4294901760, %v483_v37 }
  0x57   : > { %1593 = vmatprep.subr.msk.mxu0 %vm2325_vm9, %v2988_v17  ;;  %1628 = vmatpush3.msra.mxu1 %v463_v11  ;;  %v2430_v54 = vand.u32 4294901760, %v2411_v5  ;;  %v497_v61 = vsub.f32 %v2380_v30, %v2409_v46  ;;  %v1362_v62 = vsel %vm2399_vm12, 1.0, %v2033_v20  ;;  %v1361_v3 = vsel %vm2404_vm13, 1.0, %v2033_v20 }
  0x58   : > { %1594 = vmatpush3.msk.msra.mxu0 %vm2325_vm9, %v2988_v17  ;;  %1629 = vmatprep.subr.mxu1 %v470_v34  ;;  %v2455_v7 = vand.u32 4294901760, %v2438_v56  ;;  %v2983_v63 = vand.u32 4294901760, %v2207_v22  ;;  %v2982_v4 = vand.u32 4294901760, %v2393_v42  ;;  %v2459_v8 = vsub.f32 %v1362_v62, %v1362_v62 }
  0x59   : > { %1595 = vmatprep.subr.msk.mxu0 %vm2350_vm10, %v2988_v17  ;;  %1630 = vmatpush3.msra.mxu1 %v470_v34  ;;  %v491_v10 = vand.u32 4294901760, %v490_v49  ;;  %v504_v11 = vsub.f32 %v2411_v5, %v2430_v54  ;;  %v2466_v12 = vsub.f32 %v1361_v3, %v1361_v3  ;;  %v1360_v24 = vsel %vm2425_vm14, 1.0, %v2033_v20 }
  0x5a   : > { %1596 = vmatpush3.msk.msra.mxu0 %vm2350_vm10, %v2988_v17  ;;  %1631 = vmatprep.subr.mxu1 %v477_v47  ;;  %v2475_v32 = vand.u32 4294901760, %v2459_v8  ;;  %v2477_v34 = vsub.f32 %v1360_v24, %v1360_v24  ;;  %v498_v37 = vand.u32 4294901760, %v497_v61  ;;  %v511_v39 = vsub.f32 %v2438_v56, %v2455_v7 }
  0x5b   : > { %1597 = vmatprep.subr.msk.mxu0 %vm2373_vm11, %v2988_v17  ;;  %1632 = vmatpush3.msra.mxu1 %v477_v47  ;;  %v1359_v49 = vsel %vm2434_vm15, 1.0, %v2033_v20  ;;  %v353_v47 = vsub.f32 %v2207_v22, %v2983_v63  ;;  %v2494_v51 = vand.u32 4294901760, %v2466_v12  ;;  %v505_v20 = vand.u32 4294901760, %v504_v11  ;;  %v264_v63 = vld [vmem:[%s2143_s28 + $0x18] sm:$0xff] }
  0x5c   : > { %1598 = vmatpush3.msk.msra.mxu0 %vm2373_vm11, %v2988_v17  ;;  %1633 = vmatprep.subr.mxu1 %v484_v59  ;;  %v2496_v61 = vsub.f32 %v1359_v49, %v1359_v49  ;;  %v363_v62 = vsub.f32 %v2393_v42, %v2982_v4  ;;  %v2510_v3 = vand.u32 4294901760, %v2477_v34  ;;  %v512_v11 = vand.u32 4294901760, %v511_v39  ;;  %v263_v39 = vld [vmem:[%s2143_s28 + $0x10] sm:$0xff] }
  0x5d   : > { %1599 = vmatprep.subr.msk.mxu0 %vm2399_vm12, %v2988_v17  ;;  %1634 = vmatpush3.msra.mxu1 %v484_v59  ;;  %3030 = vst [vmem:[#allocation12_spill] sm:$0xff] %v2494_v51  ;;  %v518_v59 = vsub.f32 %v2459_v8, %v2475_v32  ;;  %v354_v24 = vand.u32 4294901760, %v353_v47 }
  0x5e   : > { %1600 = vmatpush3.msk.msra.mxu0 %vm2399_vm12, %v2988_v17  ;;  %1635 = vmatprep.subr.mxu1 %v491_v10  ;;  %v2521_v49 = vand.u32 4294901760, %v2496_v61  ;;  %v364_v4 = vand.u32 4294901760, %v363_v62  ;;  %v532_v47 = vsub.f32 %v2477_v34, %v2510_v3 }
  0x5f   : > { %1601 = vmatprep.subr.msk.mxu0 %vm2404_vm13, %v2988_v17  ;;  %1636 = vmatpush3.msra.mxu1 %v491_v10  ;;  %v525_v10 = vsub.f32 %v2466_v12, %v2494_v51  ;;  %v2538_v51 = vand.u32 4294901760, %v263_v39 }
  0x60   : > { %1602 = vmatpush3.msk.msra.mxu0 %vm2404_vm13, %v2988_v17  ;;  %1637 = vmatprep.subr.mxu1 %v498_v37  ;;  %v539_v2 = vsub.f32 %v2496_v61, %v2521_v49 }
  0x61   : > { %1603 = vmatprep.subr.msk.mxu0 %vm2425_vm14, %v2988_v17  ;;  %1638 = vmatpush3.msra.mxu1 %v498_v37  ;;  %v519_v37 = vand.u32 4294901760, %v518_v59  ;;  %v526_v62 = vand.u32 4294901760, %v525_v10  ;;  %v2542_v59 = vand.u32 4294901760, %v264_v63  ;;  %v266_v10 = vld [vmem:[%s2143_s28 + $0x28] sm:$0xff] }
  0x62   : > { %1604 = vmatpush3.msk.msra.mxu0 %vm2425_vm14, %v2988_v17  ;;  %1639 = vmatprep.subr.mxu1 %v505_v20 }
  0x63   : > { %1605 = vmatprep.subr.msk.mxu0 %vm2434_vm15, %v2988_v17  ;;  %1640 = vmatpush3.msra.mxu1 %v505_v20  ;;  %v533_v20 = vand.u32 4294901760, %v532_v47  ;;  %v3031_v47 = vmov 1.0  }
  0x64   : > { %1606 = vmatpush3.msk.msra.mxu0 %vm2434_vm15, %v2988_v17  ;;  %1641 = vmatprep.subr.mxu1 %v512_v11  ;;  %v265_v17 = vld [vmem:[%s2143_s28 + $0x20] sm:$0xff]  ;;  %v3036_v15 = vld [vmem:[#allocation12_spill] sm:$0xff] }
  0x65   : > { %1607 = vmatprep.mubr.f32.mxu0 %v354_v24  ;;  %1642 = vmatpush3.msra.mxu1 %v512_v11  ;;  %v540_v11 = vand.u32 4294901760, %v539_v2  ;;  %v2548_v24 = vsub.f32 %v263_v39, %v2538_v51  ;;  %v2559_v2 = vand.u32 4294901760, %v266_v10  ;;  %v267_v39 = vld [vmem:[%s2143_s28 + $0x30] sm:$0xff] }
  0x66   : > { %1663 = vmatprep.subr.mxu0 %v2212_v23  ;;  %1608 = vmatmul.mubr.f32.vlgmr.msra.gmra.mxu0 %v364_v4  ;;  %v2556_v4 = vsub.f32 %v264_v63, %v2542_v59  ;;  %v268_v63 = vld [vmem:[%s2143_s28 + $0x38] sm:$0xff] }
  0x67   : > { %1643 = vmatprep.subr.mxu1 %v519_v37  ;;  %1664 = vmatpush3.msra.mxu0 %v2212_v23  ;;  %v2552_v23 = vand.u32 4294901760, %v265_v17 }
  0x68   : > { %1644 = vmatpush3.msra.mxu1 %v519_v37  ;;  %1665 = vmatprep.subr.mxu0 %v2229_v28  ;;  %v3034_v13 = vand.u32 4294901760, %v2556_v4 }
  0x69   : > { %1645 = vmatprep.subr.mxu1 %v526_v62  ;;  %1666 = vmatpush3.msra.mxu0 %v2229_v28  ;;  %v372_v28 = vand.u32 4294901760, %v2548_v24  ;;  %v2566_v37 = vsub.f32 %v265_v17, %v2552_v23 }
  0x6a   : > { %1646 = vmatpush3.msra.mxu1 %v526_v62  ;;  %1667 = vmatprep.subr.mxu0 %v2231_v29  ;;  %v2579_v62 = vand.u32 4294901760, %v267_v39 }
  0x6b   : > { %1647 = vmatprep.subr.mxu1 %v533_v20  ;;  %1668 = vmatpush3.msra.mxu0 %v2231_v29  ;;  %v2990_v29 = vand.u32 4294901760, %v2556_v4  ;;  %v373_v17 = vsub.f32 %v2548_v24, %v372_v28 }
  0x6c   : > { %1648 = vmatpush3.msra.mxu1 %v533_v20  ;;  %1669 = vmatprep.subr.mxu0 %v2243_v33  ;;  %v2593_v20 = vand.u32 4294901760, %v268_v63 }
  0x6d   : > { %1649 = vmatprep.subr.mxu1 %v540_v11  ;;  %1670 = vmatpush3.msra.mxu0 %v2243_v33  ;;  %v2577_v33 = vsub.f32 %v266_v10, %v2559_v2  ;;  %v2608_v10 = vsub.f32 %v267_v39, %v2579_v62 }
  0x6e   : > { %1650 = vmatpush3.msra.mxu1 %v540_v11  ;;  %1671 = vmatprep.subr.mxu0 %v2258_v38  ;;  %v2622_v39 = vsub.f32 %v268_v63, %v2593_v20 }
  0x6f   : > { %1652 = vmatmul.mubr.f32.vlgmr.msra.gmra.mxu1 %v2188_v16  ;;  %1672 = vmatpush3.msra.mxu0 %v2258_v38  ;;  %v392_v38 = vand.u32 4294901760, %v2566_v37  ;;  %v2991_v11 = vand.u32 4294901760, %v2577_v33  ;;  %v412_v63 = vand.u32 4294901760, %v2608_v10  ;;  %v3035_v14 = vand.u32 4294901760, %v2577_v33 }
  0x70   : > { %1707 = vmatprep.subr.msk.mxu1 %vm2173_vm0, %v3031_v47  ;;  %1673 = vmatprep.subr.mxu0 %v2297_v50 }
  0x71   : > { %1708 = vmatpush3.msk.msra.mxu1 %vm2173_vm0, %v3031_v47  ;;  %1674 = vmatpush3.msra.mxu0 %v2297_v50  ;;  %v383_v50 = vsub.f32 %v2556_v4, %v2990_v29  ;;  %v393_v29 = vsub.f32 %v2566_v37, %v392_v38 }
  0x72   : > { %1709 = vmatprep.subr.msk.mxu1 %vm2178_vm1, %v3031_v47  ;;  %1675 = vmatprep.subr.mxu0 %v2319_v58 }
  0x73   : > { %1710 = vmatpush3.msk.msra.mxu1 %vm2178_vm1, %v3031_v47  ;;  %1676 = vmatpush3.msra.mxu0 %v2319_v58  ;;  %v374_v58 = vand.u32 4294901760, %v373_v17  ;;  %v403_v17 = vsub.f32 %v2577_v33, %v2991_v11 }
  0x74   : > { %1711 = vmatprep.subr.msk.mxu1 %vm2183_vm2, %v3031_v47  ;;  %1677 = vmatprep.subr.mxu0 %v2341_v1 }
  0x75   : > { %1712 = vmatpush3.msk.msra.mxu1 %vm2183_vm2, %v3031_v47  ;;  %1678 = vmatpush3.msra.mxu0 %v2341_v1  ;;  %v384_v1 = vand.u32 4294901760, %v383_v50  ;;  %v422_v50 = vand.u32 4294901760, %v2622_v39  ;;  %v404_v11 = vand.u32 4294901760, %v403_v17 }
  0x76   : > { %1713 = vmatprep.subr.msk.mxu1 %vm2194_vm3, %v3031_v47  ;;  %1679 = vmatprep.subr.mxu0 %v2355_v9 }
  0x77   : > { %1714 = vmatpush3.msk.msra.mxu1 %vm2194_vm3, %v3031_v47  ;;  %1680 = vmatpush3.msra.mxu0 %v2355_v9  ;;  %v394_v9 = vand.u32 4294901760, %v393_v29 }
  0x78   : > { %1715 = vmatprep.subr.msk.mxu1 %vm2199_vm4, %v3031_v47  ;;  %1681 = vmatprep.subr.mxu0 %v2380_v30 }
  0x79   : > { %1716 = vmatpush3.msk.msra.mxu1 %vm2199_vm4, %v3031_v47  ;;  %1610 = vmatprep.mubr.f32.mxu0 %v374_v58 }
  0x7a   : > { %1682 = vmatpush3.msra.mxu0 %v2380_v30  ;;  %1717 = vmatprep.subr.msk.mxu1 %vm2225_vm5, %v3031_v47  ;;  %v413_v30 = vsub.f32 %v2608_v10, %v412_v63 }
  0x7b   : > { %1611 = vmatmul.mubr.f32.gmra.mxu0 %v384_v1  ;;  %1683 = vmatprep.subr.mxu0 %v2411_v5 }
  0x7c   : > { %1718 = vmatpush3.msk.msra.mxu1 %vm2225_vm5, %v3031_v47  ;;  %1684 = vmatpush3.msra.mxu0 %v2411_v5  ;;  %v423_v5 = vsub.f32 %v2622_v39, %v422_v50  ;;  %v414_v29 = vand.u32 4294901760, %v413_v30 }
  0x7d   : > { %1719 = vmatprep.subr.msk.mxu1 %vm2266_vm6, %v3031_v47  ;;  %1685 = vmatprep.subr.mxu0 %v2438_v56 }
  0x7e   : > { %1720 = vmatpush3.msk.msra.mxu1 %vm2266_vm6, %v3031_v47  ;;  %1613 = vmatprep.mubr.f32.mxu0 %v394_v9 }
  0x7f   : > { %1686 = vmatpush3.msra.mxu0 %v2438_v56  ;;  %1721 = vmatprep.subr.msk.mxu1 %vm2291_vm7, %v3031_v47  ;;  %v424_v56 = vand.u32 4294901760, %v423_v5 }
  0x80   : > { %1614 = vmatmul.mubr.f32.gmra.mxu0 %v404_v11  ;;  %1687 = vmatprep.subr.mxu0 %v2459_v8 }
  0x81   : > { %1722 = vmatpush3.msk.msra.mxu1 %vm2291_vm7, %v3031_v47  ;;  %1654 = vmatprep.mubr.f32.mxu1 %v2538_v51 }
  0x82   : > { %1688 = vmatpush3.msra.mxu0 %v2459_v8  ;;  %1723 = vmatprep.subr.msk.mxu1 %vm2303_vm8, %v3031_v47 }
  0x83   : > { %1655 = vmatmul.mubr.f32.gmra.mxu1 %v2542_v59  ;;  %1689 = vmatprep.subr.mxu0 %v2466_v12 }
  0x84   : > { %1724 = vmatpush3.msk.msra.mxu1 %vm2303_vm8, %v3031_v47  ;;  %1616 = vmatprep.mubr.f32.mxu0 %v414_v29 }
  0x85   : > { %1690 = vmatpush3.msra.mxu0 %v2466_v12  ;;  %1725 = vmatprep.subr.msk.mxu1 %vm2325_vm9, %v3031_v47 }
  0x86   : > { %1617 = vmatmul.mubr.f32.gmra.mxu0 %v424_v56  ;;  %1691 = vmatprep.subr.mxu0 %v2477_v34 }
  0x87   : > { %1726 = vmatpush3.msk.msra.mxu1 %vm2325_vm9, %v3031_v47  ;;  %1657 = vmatprep.mubr.f32.mxu1 %v2552_v23 }
  0x88   : > { %1692 = vmatpush3.msra.mxu0 %v2477_v34  ;;  %1727 = vmatprep.subr.msk.mxu1 %vm2350_vm10, %v3031_v47 }
  0x89   : > { %1658 = vmatmul.mubr.f32.gmra.mxu1 %v2559_v2  ;;  %1693 = vmatprep.subr.mxu0 %v2496_v61 }
  0x8a   : > { %1728 = vmatpush3.msk.msra.mxu1 %vm2350_vm10, %v3031_v47  ;;  %1694 = vmatpush3.msra.mxu0 %v2496_v61 }
  0x8b   : > { %1695 = vmatprep.mubr.f32.mxu0 %v2207_v22  ;;  %1729 = vmatprep.subr.msk.mxu1 %vm2373_vm11, %v3031_v47 }
  0x8c   : > { %1696 = vmatmul.mubr.f32.vlgmr.msra.gmra.mxu0 %v2393_v42  ;;  %1730 = vmatpush3.msk.msra.mxu1 %vm2373_vm11, %v3031_v47 }
  0x8d   : > { %1751 = vmatprep.subr.mxu0 %v2240_v31  ;;  %1660 = vmatprep.mubr.f32.mxu1 %v2579_v62 }
  0x8e   : > { %1731 = vmatprep.subr.msk.mxu1 %vm2399_vm12, %v3031_v47  ;;  %1752 = vmatpush3.msra.mxu0 %v2240_v31  ;;  %v3032_v31 = vand.u32 4294901760, %v2207_v22 }
  0x8f   : > { %1661 = vmatmul.mubr.f32.gmra.mxu1 %v2593_v20  ;;  %1753 = vmatprep.subr.mxu0 %v2252_v35 }
  0x90   : > { %1732 = vmatpush3.msk.msra.mxu1 %vm2399_vm12, %v3031_v47  ;;  %1698 = vmatprep.mubr.f32.mxu0 %v2548_v24 }
  0x91   : > { %1733 = vmatprep.subr.msk.mxu1 %vm2404_vm13, %v3031_v47  ;;  %1754 = vmatpush3.msra.mxu0 %v2252_v35  ;;  %v3033_v35 = vand.u32 4294901760, %v2393_v42 }
  0x92   : > { %1699 = vmatmul.mubr.f32.gmra.mxu0 %v2556_v4  ;;  %1734 = vmatpush3.msk.msra.mxu1 %vm2404_vm13, %v3031_v47 }
  0x93   : > { %1755 = vmatprep.subr.mxu0 %v2255_v36  ;;  %1735 = vmatprep.subr.msk.mxu1 %vm2425_vm14, %v3031_v47 }
  0x94   : > { %1756 = vmatpush3.msra.mxu0 %v2255_v36  ;;  %1736 = vmatpush3.msk.msra.mxu1 %vm2425_vm14, %v3031_v47 }
  0x95   : > { %1757 = vmatprep.subr.mxu0 %v2271_v41  ;;  %1701 = vmatprep.mubr.f32.mxu0 %v2566_v37 }
  0x96   : > { %1737 = vmatprep.subr.msk.mxu1 %vm2434_vm15, %v3031_v47  ;;  %1758 = vmatpush3.msra.mxu0 %v2271_v41 }
  0x97   : > { %1702 = vmatmul.mubr.f32.gmra.mxu0 %v2577_v33  ;;  %1738 = vmatpush3.msk.msra.mxu1 %vm2434_vm15, %v3031_v47 }
  0x98   : > { %1739 = vmatprep.mubr.f32.mxu1 %v3032_v31  ;;  %1759 = vmatprep.subr.mxu0 %v2284_v45 }
  0x99   : > { %1740 = vmatmul.mubr.f32.vlgmr.msra.gmra.mxu1 %v3033_v35  ;;  %1760 = vmatpush3.msra.mxu0 %v2284_v45 }
  0x9a   : > { %1795 = vmatprep.subr.msk.mxu1 %vm2173_vm0, %v3031_v47  ;;  %1761 = vmatprep.subr.mxu0 %v2317_v57 }
  0x9b   : > { %1796 = vmatpush3.msk.msra.mxu1 %vm2173_vm0, %v3031_v47  ;;  %1704 = vmatprep.mubr.f32.mxu0 %v2608_v10 }
  0x9c   : > { %1762 = vmatpush3.msra.mxu0 %v2317_v57  ;;  %1797 = vmatprep.subr.msk.mxu1 %vm2178_vm1, %v3031_v47 }
  0x9d   : > { %1705 = vmatmul.mubr.f32.gmra.mxu0 %v2622_v39  ;;  %1742 = vmatprep.mubr.f32.mxu1 %v372_v28 }
  0x9e   : > { %1763 = vmatprep.subr.mxu0 %v2339_v0  ;;  %1798 = vmatpush3.msk.msra.mxu1 %vm2178_vm1, %v3031_v47 }
  0x9f   : > { %1743 = vmatmul.mubr.f32.gmra.mxu1 %v3034_v13  ;;  %1764 = vmatpush3.msra.mxu0 %v2339_v0 }
  0xa0   : > { %1799 = vmatprep.subr.msk.mxu1 %vm2183_vm2, %v3031_v47  ;;  %1765 = vmatprep.subr.mxu0 %v2364_v21 }
  0xa1   : > { %1800 = vmatpush3.msk.msra.mxu1 %vm2183_vm2, %v3031_v47  ;;  %1766 = vmatpush3.msra.mxu0 %v2364_v21 }
  0xa2   : > { %1801 = vmatprep.subr.msk.mxu1 %vm2194_vm3, %v3031_v47  ;;  %1745 = vmatprep.mubr.f32.mxu1 %v392_v38 }
  0xa3   : > { %1767 = vmatprep.subr.mxu0 %v2378_v26  ;;  %1802 = vmatpush3.msk.msra.mxu1 %vm2194_vm3, %v3031_v47 }
  0xa4   : > { %1746 = vmatmul.mubr.f32.gmra.mxu1 %v3035_v14  ;;  %1768 = vmatpush3.msra.mxu0 %v2378_v26 }
  0xa5   : > { %1803 = vmatprep.subr.msk.mxu1 %vm2199_vm4, %v3031_v47  ;;  %1769 = vmatprep.subr.mxu0 %v2409_v46 }
  0xa6   : > { %1804 = vmatpush3.msk.msra.mxu1 %vm2199_vm4, %v3031_v47  ;;  %1770 = vmatpush3.msra.mxu0 %v2409_v46 }
  0xa7   : > { %1805 = vmatprep.subr.msk.mxu1 %vm2225_vm5, %v3031_v47  ;;  %1748 = vmatprep.mubr.f32.mxu1 %v412_v63 }
  0xa8   : > { %1771 = vmatprep.subr.mxu0 %v2430_v54  ;;  %1806 = vmatpush3.msk.msra.mxu1 %vm2225_vm5, %v3031_v47 }
  0xa9   : > { %1749 = vmatmul.mubr.f32.gmra.mxu1 %v422_v50  ;;  %1772 = vmatpush3.msra.mxu0 %v2430_v54 }
  0xaa   : > { %1807 = vmatprep.subr.msk.mxu1 %vm2266_vm6, %v3031_v47  ;;  %1773 = vmatprep.subr.mxu0 %v2455_v7 }
  0xab   : > { %1808 = vmatpush3.msk.msra.mxu1 %vm2266_vm6, %v3031_v47  ;;  %1774 = vmatpush3.msra.mxu0 %v2455_v7 }
  0xac   : > { %1809 = vmatprep.subr.msk.mxu1 %vm2291_vm7, %v3031_v47  ;;  %1775 = vmatprep.subr.mxu0 %v2475_v32 }
  0xad   : > { %1810 = vmatpush3.msk.msra.mxu1 %vm2291_vm7, %v3031_v47  ;;  %1776 = vmatpush3.msra.mxu0 %v2475_v32 }
  0xae   : > { %1811 = vmatprep.subr.msk.mxu1 %vm2303_vm8, %v3031_v47  ;;  %1777 = vmatprep.subr.mxu0 %v3036_v15 }
  0xaf   : > { %1812 = vmatpush3.msk.msra.mxu1 %vm2303_vm8, %v3031_v47  ;;  %1778 = vmatpush3.msra.mxu0 %v3036_v15 }
  0xb0   : > { %1813 = vmatprep.subr.msk.mxu1 %vm2325_vm9, %v3031_v47  ;;  %1779 = vmatprep.subr.mxu0 %v2510_v3 }
  0xb1   : > { %1814 = vmatpush3.msk.msra.mxu1 %vm2325_vm9, %v3031_v47  ;;  %1780 = vmatpush3.msra.mxu0 %v2510_v3 }
  0xb2   : > { %1815 = vmatprep.subr.msk.mxu1 %vm2350_vm10, %v3031_v47  ;;  %1781 = vmatprep.subr.mxu0 %v2521_v49 }
  0xb3   : > { %1816 = vmatpush3.msk.msra.mxu1 %vm2350_vm10, %v3031_v47  ;;  %1782 = vmatpush3.msra.mxu0 %v2521_v49 }
  0xb4   : > { %1783 = vmatprep.mubr.f32.mxu0 %v3037_v18  ;;  %1817 = vmatprep.subr.msk.mxu1 %vm2373_vm11, %v3031_v47 }
  0xb5   : > { %1784 = vmatmul.mubr.f32.vlgmr.msra.gmra.mxu0 %v2188_v16  ;;  %1818 = vmatpush3.msk.msra.mxu1 %vm2373_vm11, %v3031_v47 }
  0xb6   : > { %1819 = vmatprep.subr.msk.mxu1 %vm2399_vm12, %v3031_v47  ;;  %1786 = vmatprep.mubr.f32.mxu0 %v2538_v51 }
  0xb7   : > { %1820 = vmatpush3.msk.msra.mxu1 %vm2399_vm12, %v3031_v47  ;;  %1827 = vmatprep.mubr.f32.mxu1 %v3037_v18 }
  0xb8   : > { %1821 = vmatprep.subr.msk.mxu1 %vm2404_vm13, %v3031_v47 }
  0xb9   : > { %1787 = vmatmul.mubr.f32.gmra.mxu0 %v2542_v59  ;;  %1822 = vmatpush3.msk.msra.mxu1 %vm2404_vm13, %v3031_v47 }
  0xba   : > { %1823 = vmatprep.subr.msk.mxu1 %vm2425_vm14, %v3031_v47  ;;  %1789 = vmatprep.mubr.f32.mxu0 %v2552_v23 }
  0xbb   : > { %1824 = vmatpush3.msk.msra.mxu1 %vm2425_vm14, %v3031_v47 }
  0xbc   : > { %1825 = vmatprep.subr.msk.mxu1 %vm2434_vm15, %v3031_v47 }
  0xbd   : > { %1790 = vmatmul.mubr.f32.gmra.mxu0 %v2559_v2  ;;  %1826 = vmatpush3.msk.msra.mxu1 %vm2434_vm15, %v3031_v47 }
  0xbe   : > { %1828 = vmatmul.mubr.f32.vlgmr.msra.gmra.mxu1 %v2188_v16  ;;  %1792 = vmatprep.mubr.f32.mxu0 %v2579_v62 }
  0xbf   : > { %1830 = vmatprep.mubr.f32.mxu1 %v2538_v51 }
  0xc1   : > { %1793 = vmatmul.mubr.f32.gmra.mxu0 %v2593_v20 }
  0xc2   : > { %1831 = vmatmul.mubr.f32.gmra.mxu1 %v2542_v59 }
  0xc3   : > { %1833 = vmatprep.mubr.f32.mxu1 %v2552_v23 }
  0xc6   : > { %1834 = vmatmul.mubr.f32.gmra.mxu1 %v2559_v2 }
  0xc7   : > { %1836 = vmatprep.mubr.f32.mxu1 %v2579_v62 }
  0xca   : > { %1837 = vmatmul.mubr.f32.gmra.mxu1 %v2593_v20 }
 0x126   : > { %v1609_v19 = vpop.f32.mrf.mxu0 }
 0x128   : > { %v356_v22 = vpop.f32.mrf.mxu0 }
 0x12f   : > { %v1653_v36 = vpop.f32.mrf.mxu1 }
 0x130   : > { %v584_v3 = vadd.f32 %v1653_v36, %v1609_v19 }
 0x131   : > { %v577_v41 = vpop.f32.mrf.mxu1 }
 0x132   : > { %v578_v24 = vadd.f32 %v577_v41, %v356_v22 }
 0x13b   : > { %v1612_v27 = vpop.f32.mrf.mxu0 }
 0x13d   : > { %v376_v16 = vpop.f32.mrf.mxu0 }
 0x140   : > { %v1615_v40 = vpop.f32.mrf.mxu0 }
 0x142   : > { %v396_v48 = vpop.f32.mrf.mxu0 }
 0x143   : > { %v1656_v45 = vpop.f32.mrf.mxu1 }
 0x144   : > { %v596_v2 = vadd.f32 %v1656_v45, %v1612_v27 }
 0x145   : > { %v589_v52 = vpop.f32.mrf.mxu1 }
 0x146   : > { %v1618_v57 = vpop.f32.mrf.mxu0  ;;  %v590_v62 = vadd.f32 %v589_v52, %v376_v16 }
 0x148   : > { %v416_v0 = vpop.f32.mrf.mxu0 }
 0x149   : > { %v1659_v60 = vpop.f32.mrf.mxu1 }
 0x14a   : > { %v608_v58 = vadd.f32 %v1659_v60, %v1615_v40 }
 0x14b   : > { %v601_v6 = vpop.f32.mrf.mxu1 }
 0x14c   : > { %v1697_v21 = vpop.f32.mrf.mxu0  ;;  %v602_v50 = vadd.f32 %v601_v6, %v396_v48 }
 0x14d   : > { %v731_v23 = vadd.f32 %v1697_v21, %v584_v3 }
 0x14e   : > { %v723_v26 = vpop.f32.mrf.mxu0 }
 0x14f   : > { %v1662_v25 = vpop.f32.mrf.mxu1  ;;  %v724_v28 = vadd.f32 %v723_v26, %v578_v24 }
 0x150   : > { %v620_v13 = vadd.f32 %v1662_v25, %v1618_v57 }
 0x151   : > { %v613_v42 = vpop.f32.mrf.mxu1 }
 0x152   : > { %v1700_v43 = vpop.f32.mrf.mxu0  ;;  %v614_v27 = vadd.f32 %v613_v42, %v416_v0 }
 0x153   : > { %v745_v38 = vadd.f32 %v1700_v43, %v596_v2 }
 0x154   : > { %v737_v46 = vpop.f32.mrf.mxu0 }
 0x155   : > { %v738_v1 = vadd.f32 %v737_v46, %v590_v62 }
 0x157   : > { %v1703_v54 = vpop.f32.mrf.mxu0 }
 0x158   : > { %v759_v29 = vadd.f32 %v1703_v54, %v608_v58 }
 0x159   : > { %v1741_v44 = vpop.f32.mrf.mxu1  ;;  %v751_v7 = vpop.f32.mrf.mxu0 }
 0x15a   : > { %v870_v37 = vadd.f32 %v1741_v44, %v731_v23  ;;  %v752_v15 = vadd.f32 %v751_v7, %v602_v50 }
 0x15b   : > { %v861_v53 = vpop.f32.mrf.mxu1 }
 0x15c   : > { %v862_v20 = vadd.f32 %v861_v53, %v724_v28 }
 0x15d   : > { %v1706_v12 = vpop.f32.mrf.mxu0 }
 0x15e   : > { %v773_v40 = vadd.f32 %v1706_v12, %v620_v13 }
 0x15f   : > { %v1744_v55 = vpop.f32.mrf.mxu1  ;;  %v765_v34 = vpop.f32.mrf.mxu0 }
 0x160   : > { %v886_v17 = vadd.f32 %v1744_v55, %v745_v38  ;;  %v766_v60 = vadd.f32 %v765_v34, %v614_v27 }
 0x161   : > { %v877_v8 = vpop.f32.mrf.mxu1 }
 0x162   : > { %v878_v56 = vadd.f32 %v877_v8, %v738_v1 }
 0x164   : > { %v1747_v32 = vpop.f32.mrf.mxu1 }
 0x165   : > { %v902_v18 = vadd.f32 %v1747_v32, %v759_v29 }
 0x166   : > { %v893_v51 = vpop.f32.mrf.mxu1 }
 0x167   : > { %v894_v41 = vadd.f32 %v893_v51, %v752_v15 }
 0x169   : > { %v1750_v59 = vpop.f32.mrf.mxu1 }
 0x16a   : > { %v918_v57 = vadd.f32 %v1750_v59, %v773_v40 }
 0x16b   : > { %v909_v33 = vpop.f32.mrf.mxu1 }
 0x16c   : > { %v910_v0 = vadd.f32 %v909_v33, %v766_v60 }
 0x175   : > { %v1785_v61 = vpop.f32.mrf.mxu0 }
 0x176   : > { %v1043_v11 = vadd.f32 %v1785_v61, %v870_v37 }
 0x177   : > { %v1036_v49 = vpop.f32.mrf.mxu0 }
 0x178   : > { %v1037_v63 = vadd.f32 %v1036_v49, %v862_v20 }
 0x179   : > { %v1788_v4 = vpop.f32.mrf.mxu0 }
 0x17a   : > { %v1055_v31 = vadd.f32 %v1788_v4, %v886_v17 }
 0x17b   : > { %v1048_v47 = vpop.f32.mrf.mxu0 }
 0x17c   : > { %v1049_v19 = vadd.f32 %v1048_v47, %v878_v56 }
 0x17d   : > { %v1791_v10 = vpop.f32.mrf.mxu0 }
 0x17e   : > { %v1829_v39 = vpop.f32.mrf.mxu1  ;;  %v1067_v45 = vadd.f32 %v1791_v10, %v902_v18 }
 0x17f   : > { %v1172_v9 = vadd.f32 %v1829_v39, %v1043_v11  ;;  %v1060_v30 = vpop.f32.mrf.mxu0 }
 0x180   : > { %v1165_v5 = vpop.f32.mrf.mxu1  ;;  %v1061_v6 = vadd.f32 %v1060_v30, %v894_v41 }
 0x181   : > { %1212 = vst [vmem:[%s2152_s30 + $0x8] sm:$0xff] %v1172_v9  ;;  %v1166_v35 = vadd.f32 %v1165_v5, %v1037_v63  ;;  %v1794_v16 = vpop.f32.mrf.mxu0 }
 0x182   : > { %v1832_v14 = vpop.f32.mrf.mxu1  ;;  %v1079_v42 = vadd.f32 %v1794_v16, %v918_v57 }
 0x183   : > { %1211 = vst [vmem:[%s2152_s30] sm:$0xff] %v1166_v35  ;;  %v1184_v22 = vadd.f32 %v1832_v14, %v1055_v31  ;;  %v1072_v25 = vpop.f32.mrf.mxu0 }
 0x184   : > { %v1177_v36 = vpop.f32.mrf.mxu1  ;;  %v1073_v46 = vadd.f32 %v1072_v25, %v910_v0 }
 0x185   : > { %1214 = vst [vmem:[%s2152_s30 + $0x18] sm:$0xff] %v1184_v22  ;;  %v1178_v48 = vadd.f32 %v1177_v36, %v1049_v19 }
 0x186   : > { %v1835_v52 = vpop.f32.mrf.mxu1 }
 0x187   : > { %1213 = vst [vmem:[%s2152_s30 + $0x10] sm:$0xff] %v1178_v48  ;;  %v1196_v21 = vadd.f32 %v1835_v52, %v1067_v45 }
 0x188   : > { %v1189_v26 = vpop.f32.mrf.mxu1 }
 0x189   : > { %1216 = vst [vmem:[%s2152_s30 + $0x28] sm:$0xff] %v1196_v21  ;;  %v1190_v43 = vadd.f32 %v1189_v26, %v1061_v6 }
 0x18a   : > { %v1838_v44 = vpop.f32.mrf.mxu1 }
 0x18b   : > { %1215 = vst [vmem:[%s2152_s30 + $0x20] sm:$0xff] %v1190_v43  ;;  %v1208_v53 = vadd.f32 %v1838_v44, %v1079_v42 }
 0x18c   : > { %v1201_v54 = vpop.f32.mrf.mxu1 }
 0x18d   : > { %1218 = vst [vmem:[%s2152_s30 + $0x38] sm:$0xff] %v1208_v53  ;;  %v1202_v55 = vadd.f32 %v1201_v54, %v1073_v46 }
 0x18f   : > { %1217 = vst [vmem:[%s2152_s30 + $0x30] sm:$0xff] %v1202_v55 }
 0x190 PF: > { %p1423_p8 = scmp.ne.s32.totalorder %s2150_s29, 0 }
 0x192   : > { %1222 = sbr.rel (%p1423_p8) target bundleno = 412 (0x19c), region = 36 }
 0x197   : > { %v1223_v7 = vld [vmem:[%s2143_s28] sm:$0xff]  ;;  %v1224_v8 = vld [vmem:[%s2143_s28 + $0x8] sm:$0xff]  ;;  %v1225_v12 = vld [vmem:[%s2143_s28 + $0x10] sm:$0xff] }
 0x198   : > { %1231 = vst [vmem:[%s2152_s30] sm:$0xff] %v1223_v7  ;;  %1232 = vst [vmem:[%s2152_s30 + $0x8] sm:$0xff] %v1224_v8  ;;  %v1226_v32 = vld [vmem:[%s2143_s28 + $0x18] sm:$0xff]  ;;  %v1227_v34 = vld [vmem:[%s2143_s28 + $0x20] sm:$0xff] }
 0x199   : > { %1233 = vst [vmem:[%s2152_s30 + $0x10] sm:$0xff] %v1225_v12  ;;  %v1228_v51 = vld [vmem:[%s2143_s28 + $0x28] sm:$0xff]  ;;  %1234 = vst [vmem:[%s2152_s30 + $0x18] sm:$0xff] %v1226_v32  ;;  %v1229_v61 = vld [vmem:[%s2143_s28 + $0x30] sm:$0xff] }
 0x19a   : > { %1235 = vst [vmem:[%s2152_s30 + $0x20] sm:$0xff] %v1227_v34  ;;  %1236 = vst [vmem:[%s2152_s30 + $0x28] sm:$0xff] %v1228_v51  ;;  %v1230_v3 = vld [vmem:[%s2143_s28 + $0x38] sm:$0xff] }
 0x19b   : > { %1237 = vst [vmem:[%s2152_s30 + $0x30] sm:$0xff] %v1229_v61  ;;  %1238 = vst [vmem:[%s2152_s30 + $0x38] sm:$0xff] %v1230_v3 }
 0x19c PF: > { %s1430_s23 = sshll.u32 %s2018_s15, 10  ;;  %s1256_s6 = sshll.u32 %s2152_s30, 4  ;;  %s2931_s6 = int_to_ptr.vmem [resolvable:$true] %s1256_s6 }
 0x19d   : > { %s2928_s5 = scalar_lea.hbm %s2981_s2, %s1430_s23  ;;  %s1240_s7 = scalar_lea.sflag [#allocation6], %s2139_s21 }
 0x19e   : > { %s1944_s8 = scalar_lea.vmem %s2931_s6, 1024  ;;  %s2034_s9 = smov [#allocation7]  }
 0x19f   : > { %p1945_p0 = scmp.ne.s32.totalorder %s2931_s6, %s1944_s8  ;;  %s1948_s10 = sshll.u32 %s2034_s9, 4  ;;  %s1949_s10 = int_to_ptr.vmem [resolvable:$false] %s1948_s10 }
 0x1a0   : > { %s1950_s15 = scalar_lea.vmem %s1949_s10, 2048  ;;  %p1951_p5 = scmp.lt.s32.totalorder %s2931_s6, %s1949_s10 }
 0x1a1   : > { %p1946_p1 = pnand %p1945_p0, %p2106_p9  ;;  %p1952_p6 = scmp.lt.s32.totalorder %s1950_s15, %s1944_s8 }
 0x1a3   : > { %p1947_p3 = pneg %p1946_p1  ;;  %p1953_p7 = por %p1952_p6, %p1951_p5 }
 0x1a5   : > { %p1954_p10 = pnand %p1953_p7, %p1947_p3 }
 0x1a7   : > { %1957 = shalt.err (!%p1954_p10)
}
 0x1a8   : > { %s1958_s11 = scalar_lea.hbm %s2928_s5, 1024  ;;  %s1962_s20 = scalar_lea.hbm %s2981_s2, 2048 }
 0x1a9   : > { %p1959_p4 = scmp.ne.s32.totalorder %s2928_s5, %s1958_s11  ;;  %p1963_p12 = scmp.lt.s32.totalorder %s2928_s5, %s2981_s2 }
 0x1aa   : > { %p1964_p8 = scmp.lt.s32.totalorder %s1962_s20, %s1958_s11 }
 0x1ab   : > { %p1960_p13 = pnand %p1959_p4, %p2106_p9 }
 0x1ac   : > { %p1965_p0 = por %p1964_p8, %p1963_p12 }
 0x1ad   : > { %p1961_p2 = pneg %p1960_p13 }
 0x1af   : > { %p1966_p1 = pnand %p1965_p0, %p1961_p2 }
 0x1b1   : > { %1969 = shalt.err (!%p1966_p1)
}
 0x1b2   : > { %s2035_s28 = smov 128   ;;  %s2036_s29 = smov 8  }
 0x1b3   : > { %1841 = dma.vmem_to_hbm [thread:$0]  (%p2106_p9), %s2931_s6, 1024, %s2928_s5, %s1240_s7, %s2035_s28, %s2035_s28, %s2036_s29  }
 0x1b4 PF: > { %s1271_s30 = sand.u32 1, %s2006_s12   ;;  %p3038_p3 = scmp.ge.s32.totalorder %s2026_s17, 2 }
 0x1b5   : > { %s1272_s23 = scalar_lea.sflag [#allocation6], %s1271_s30 }
 0x1b6   : > { %p1848_p5 = pnand %p3038_p3, %p2113_p11 }
 0x1b8   : > { %p1849_p6 = pneg %p1848_p5 }
 0x1ba   : > { %2001 = dma.done.wait (%p1849_p6), %s1272_s23, 1024  }
 0x1bb   : > { %2003 = vsyncadd (%p1849_p6), %s1272_s23, 4294966272  ;;  %s22_s17 = sadd.s32 1, %s2026_s17   ;;  %s3039_s12 = smov %s2010_s13 }
 0x1bc   : > { %p19_p7 = scmp.ge.s32.totalorder %s22_s17, 4   ;;  %s3040_s13 = smov %s2014_s14 }
 0x1bd   : > { %s3041_s14 = smov %s2111_s25  ;;  %s3042_s15 = smov %s2022_s16 }
 0x1be   : > { %s3043_s16 = smov %s3045_s19  ;;  %21 = sbr.rel (!%p19_p7) target bundleno = 11 (0xb), region = 77 }
 0x1c3   :  { %1277 = vsyncpa [#allocation5], 1 }
 0x1c4   :  { %1279 = vsyncpa [#allocation5 + $0x1], 1 }
 0x1c5   :  { %1280 = vsyncpa [#allocation6], 1 }
 0x1c6   :  { %1282 = vsyncpa [#allocation6 + $0x1], 1 }

</bundles_post_ra>
